<compile_context>
chip_gen: v7x
topology: tpu7x:2x2x1
jax: 0.10.0
libtpu: 0.0.40
codegen_flags: <defaults>
</compile_context>

<pallas_src>
import jax
import jax.numpy as jnp
from jax.experimental import pallas as pl
from jax.experimental.pallas import tpu as pltpu

IN_FEATURES = 4096
OUT_FEATURES = 3
OUT_PAD = 128                       # lane-dense padded output width (one MXU N-tile)
DEFAULT_TM = 1024                   # max batch tile (bf16 x-tile 8 MiB; ~19 MiB pipelined)
VMEM_LIMIT_BYTES = 48 * 1024 * 1024 # above v5e's 16 MiB scoped default, below physical everywhere


def _round_up(n, m):
    return ((n + m - 1) // m) * m


def _linear_kernel(x_ref, w_ref, b_ref, o_ref):
    # One MXU matmul (bf16 operands, f32 accumulate) + VPU bias add; all
    # operands resident in VMEM.  The astype is a no-op when the caller
    # already supplies activations in the weight dtype.
    acc = jnp.dot(x_ref[...].astype(w_ref.dtype), w_ref[...],
                  preferred_element_type=jnp.float32)
    o_ref[...] = acc + b_ref[...]


def prepare_params(w, b, dtype=jnp.bfloat16):
    """Pad/transpose/cast parameters ONCE (at init time, not per forward).

    w: (3, 4096) PyTorch Linear layout, b: (3,)
    Returns w_pad: (4096, 128) in `dtype`, b_pad: (1, 128) f32.
    """
    w_pad = (
        jnp.zeros((IN_FEATURES, OUT_PAD), dtype=dtype)
        .at[:, :OUT_FEATURES]
        .set(w.T.astype(dtype))
    )
    b_pad = (
        jnp.zeros((1, OUT_PAD), dtype=jnp.float32)
        .at[0, :OUT_FEATURES]
        .set(b.astype(jnp.float32))
    )
    return w_pad, b_pad


def _pick_tile(batch, tm):
    """Batch tile: multiple of 8, <= tm, and >= 4 grid steps for large batches."""
    tm = max(8, _round_up(tm, 8))
    b8 = _round_up(batch, 8)
    if b8 <= 4 * 128:
        # Small batch: latency is dominated by the resident-weight fetch;
        # use as few tiles as the requested tm allows (usually one).
        return min(b8, tm)
    # Large batch: at least 4 grid steps so double-buffering stays busy and
    # v7x's two TensorCores can each take >= 2 steps of the parallel axis.
    return min(tm, _round_up(pl.cdiv(batch, 4), 8))


def dummy_action_tower_forward(x, w_pad, b_pad, *, tm=DEFAULT_TM):
    """x: (B, 4096) f32 or bf16; w_pad/b_pad from prepare_params.  Returns (B, 3) f32."""
    B = x.shape[0]
    tm_eff = _pick_tile(B, tm)
    grid = (pl.cdiv(B, tm_eff),)    # ragged last tile is masked by Pallas; no jnp.pad copy

    x_bytes = jnp.dtype(x.dtype).itemsize
    w_bytes = jnp.dtype(w_pad.dtype).itemsize
    cost = pl.CostEstimate(
        flops=2 * B * IN_FEATURES * OUT_FEATURES,      # useful flops only (mem-bound call)
        transcendentals=0,
        bytes_accessed=(
            B * IN_FEATURES * x_bytes                  # x read (dominant)
            + IN_FEATURES * OUT_PAD * w_bytes          # resident weight read (once)
            + OUT_PAD * 4                              # bias read
            + B * OUT_PAD * 4                          # f32 padded output write
        ),
    )

    out_padded = pl.pallas_call(
        _linear_kernel,
        out_shape=jax.ShapeDtypeStruct((B, OUT_PAD), jnp.float32),
        grid_spec=pltpu.PrefetchScalarGridSpec(
            num_scalar_prefetch=0,
            grid=grid,
            in_specs=[
                # x: one batch tile per grid step (pipelined DMA).
                pl.BlockSpec((tm_eff, IN_FEATURES), lambda i: (i, 0)),
                # weight / bias: constant block index -> stay resident in VMEM,
                # not re-DMA'd per step.
                pl.BlockSpec((IN_FEATURES, OUT_PAD), lambda i: (0, 0)),
                pl.BlockSpec((1, OUT_PAD), lambda i: (0, 0)),
            ],
            out_specs=pl.BlockSpec((tm_eff, OUT_PAD), lambda i: (i, 0)),
        ),
        compiler_params=pltpu.CompilerParams(
            # Batch tiles are independent -> shard grid steps across v7x's two
            # TensorCores; measured-neutral on single-TC v5e/v6e.
            dimension_semantics=("parallel",),
            # v5e's scoped-VMEM default is 16 MiB; raise it so the ~19 MiB
            # pipelined footprint at tm=1024 compiles with the intended tiling.
            vmem_limit_bytes=VMEM_LIMIT_BYTES,
        ),
        cost_estimate=cost,
    )(x, w_pad, b_pad)

    return out_padded[:B, :OUT_FEATURES]


if __name__ == "__main__":
    key = jax.random.PRNGKey(0)
    k_x, k_w, k_b = jax.random.split(key, 3)

    # Deterministic parameter init matching nn.Linear(4096, 3) shapes:
    # weight (3, 4096), bias (3,), uniform(-1/sqrt(4096), 1/sqrt(4096)).
    bound = 1.0 / jnp.sqrt(jnp.float32(IN_FEATURES))
    w = jax.random.uniform(k_w, (OUT_FEATURES, IN_FEATURES), dtype=jnp.float32,
                           minval=-bound, maxval=bound)
    b = jax.random.uniform(k_b, (OUT_FEATURES,), dtype=jnp.float32,
                           minval=-bound, maxval=bound)

    # Padding / bf16 cast hoisted out of the forward path: done once here.
    w_pad, b_pad = prepare_params(w, b)

    # --- small-batch check, bf16 activations (intended fast path) ---
    B = 8
    x = jax.random.normal(k_x, (B, IN_FEATURES), dtype=jnp.float32).astype(jnp.bfloat16)
    y = jax.block_until_ready(dummy_action_tower_forward(x, w_pad, b_pad))
    y_ref = x.astype(jnp.float32) @ w.T + b
    assert y.shape == (B, OUT_FEATURES) and y.dtype == jnp.float32
    assert jnp.allclose(y, y_ref, atol=2e-2, rtol=2e-2), float(jnp.max(jnp.abs(y - y_ref)))

    # --- ragged-tile path: f32 activations, B not a multiple of the tile ---
    B2 = 13
    x2 = jax.random.normal(jax.random.PRNGKey(1), (B2, IN_FEATURES), dtype=jnp.float32)
    y2 = jax.block_until_ready(dummy_action_tower_forward(x2, w_pad, b_pad, tm=8))
    y2_ref = x2 @ w.T + b
    assert y2.shape == (B2, OUT_FEATURES)
    assert jnp.allclose(y2, y2_ref, atol=2e-2, rtol=2e-2), float(jnp.max(jnp.abs(y2 - y2_ref)))

    print("KERNEL_OK")
</pallas_src>

<mosaic_0001>
module attributes {stable_mosaic.version = 11 : i64} {
  func.func @_linear_kernel(%arg0: i32, %arg1: memref<8x4096xbf16, #tpu.memory_space<vmem>>, %arg2: memref<4096x128xbf16, #tpu.memory_space<vmem>>, %arg3: memref<1x128xf32, #tpu.memory_space<vmem>>, %arg4: memref<8x128xf32, #tpu.memory_space<vmem>>) attributes {dimension_semantics = [#tpu.dimension_semantics<parallel>], iteration_bounds = array<i64: 1>, scalar_prefetch = 0 : i64, scratch_operands = 0 : i64, tpu.core_type = #tpu.core_type<tc>, window_params = [{transform_indices = @transform_0, window_bounds = array<i64: 8, 4096>}, {pipeline_mode = #tpu.pipeline_mode<synchronous>, transform_indices = @transform_1, window_bounds = array<i64: 4096, 128>}, {pipeline_mode = #tpu.pipeline_mode<synchronous>, transform_indices = @transform_2, window_bounds = array<i64: 1, 128>}, {transform_indices = @transform_3, window_bounds = array<i64: 8, 128>}]} {
    %c0 = arith.constant 0 : index
    %c0_0 = arith.constant 0 : index
    %0 = vector.load %arg1[%c0, %c0_0] : memref<8x4096xbf16, #tpu.memory_space<vmem>>, vector<8x4096xbf16>
    %c0_1 = arith.constant 0 : index
    %c0_2 = arith.constant 0 : index
    %1 = vector.load %arg2[%c0_1, %c0_2] : memref<4096x128xbf16, #tpu.memory_space<vmem>>, vector<4096x128xbf16>
    %cst = arith.constant dense<0.000000e+00> : vector<8x128xf32>
    %2 = tpu.matmul %0, %1, %cst {dimension_numbers = #tpu.dot_dimension_numbers<[1], [0], [0], [1], [0, 0, 1, 1], [], []>} : vector<8x4096xbf16>, vector<4096x128xbf16>, vector<8x128xf32> -> vector<8x128xf32>
    %c0_3 = arith.constant 0 : index
    %c0_4 = arith.constant 0 : index
    %3 = vector.load %arg3[%c0_3, %c0_4] : memref<1x128xf32, #tpu.memory_space<vmem>>, vector<1x128xf32>
    %4 = vector.broadcast %3 : vector<1x128xf32> to vector<8x128xf32>
    %5 = arith.addf %2, %4 : vector<8x128xf32>
    %c0_5 = arith.constant 0 : index
    %c0_6 = arith.constant 0 : index
    %6 = vector.load %arg4[%c0_5, %c0_6] : memref<8x128xf32, #tpu.memory_space<vmem>>, vector<8x128xf32>
    tpu.vector_store %arg4[%c0_5, %c0_6], %5 {strides = array<i32>} : memref<8x128xf32, #tpu.memory_space<vmem>>, vector<8x128xf32>,
    return
  }
  func.func @transform_0(%arg0: i32) -> (i32, i32) {
    %c0_i32 = arith.constant 0 : i32
    %c0_i32_0 = arith.constant 0 : i32
    return %arg0, %c0_i32 : i32, i32
  }
  func.func @transform_1(%arg0: i32) -> (i32, i32) {
    %c0_i32 = arith.constant 0 : i32
    %c0_i32_0 = arith.constant 0 : i32
    %c0_i32_1 = arith.constant 0 : i32
    return %c0_i32, %c0_i32_0 : i32, i32
  }
  func.func @transform_2(%arg0: i32) -> (i32, i32) {
    %c0_i32 = arith.constant 0 : i32
    %c0_i32_0 = arith.constant 0 : i32
    %c0_i32_1 = arith.constant 0 : i32
    return %c0_i32, %c0_i32_0 : i32, i32
  }
  func.func @transform_3(%arg0: i32) -> (i32, i32) {
    %c0_i32 = arith.constant 0 : i32
    %c0_i32_0 = arith.constant 0 : i32
    return %arg0, %c0_i32 : i32, i32
  }
}

</mosaic_0001>

<bundles_post_ra>
// kernel: tpu_custom_call.1
= control target key start
LH: loop header
LB: loop body
LE: loop exit
PB: predicated region body
PF: predicated region fallthrough
CT: control target
= control target key end

     0   :  { %8 = vsyncpa [#allocation3], 0  ;;  %s3959_s0 = inlined_call_operand.hbm [shape: bf16[8,4096], index: 0, kind: input, shape index: {}]   ;;  %s3960_s1 = inlined_call_operand.hbm [shape: bf16[4096,128], index: 1, kind: input, shape index: {}]   ;;  %s3961_s2 = inlined_call_operand.vmem [shape: f32[1,128], index: 2, kind: input, shape index: {}]   ;;  %s3962_s3 = inlined_call_operand.hbm [shape: f32[8,128], index: 3, kind: output, shape index: {}]  }
   0x1   :  { %9 = vsyncpa [#allocation6], 0 }
   0x2   :  { %10 = vsyncpa [#allocation4], 0  ;;  %s3888_s12 = smov [#allocation2]   ;;  %s3889_s14 = smov [#allocation5]  }
   0x3   :  { %s17_s13 = sshll.u32 %s3888_s12, 4  ;;  %s26_s15 = sshll.u32 %s3889_s14, 4  ;;  %s18_s13 = int_to_ptr.vmem [resolvable:$true] %s17_s13  ;;  %s3913_s15 = int_to_ptr.vmem [resolvable:$true] %s26_s15 }
   0x4   :  { %s3816_s18 = scalar_lea.hbm %s3959_s0, 2048 }
   0x5   :  { %p3817_p0 = scmp.ne.s32.totalorder %s3959_s0, %s3816_s18  ;;  %p3820_p1 = scmp.lt.u32.totalorder %s3816_s18, %s3959_s0 }
   0x7   :  { %p3822_p2 = pnand %p3820_p1, %p3817_p0 }
   0x9   :  { %3825 = shalt.err (!%p3822_p2)
}
   0xa   :  { %s3826_s23 = scalar_lea.vmem %s18_s13, 2048  ;;  %p3831_p4 = scmp.lt.s32.totalorder %s18_s13, %s18_s13 }
   0xb   :  { %p3827_p3 = scmp.ne.s32.totalorder %s18_s13, %s3826_s23  ;;  %p3832_p5 = scmp.lt.s32.totalorder %s3826_s23, %s3826_s23 }
   0xd   :  { %p3833_p6 = por %p3832_p5, %p3831_p4 }
   0xf   :  { %p3834_p7 = pnand %p3833_p6, %p3827_p3 }
  0x11   :  { %3837 = shalt.err (!%p3834_p7)
}
  0x12   :  { %20 = dma.hbm_to_vmem [thread:$0]  %s3959_s0, 2048, %s18_s13, [#allocation3]  }
  0x13   :  { %s3838_s28 = scalar_lea.hbm %s3960_s1, 32768 }
  0x14   :  { %p3839_p8 = scmp.ne.s32.totalorder %s3960_s1, %s3838_s28  ;;  %p3842_p9 = scmp.lt.u32.totalorder %s3838_s28, %s3960_s1 }
  0x16   :  { %p3844_p10 = pnand %p3842_p9, %p3839_p8 }
  0x18   :  { %3847 = shalt.err (!%p3844_p10)
}
  0x19   :  { %s3848_s6 = scalar_lea.vmem %s3913_s15, 32768  ;;  %p3853_p12 = scmp.lt.s32.totalorder %s3913_s15, %s3913_s15 }
  0x1a   :  { %p3849_p11 = scmp.ne.s32.totalorder %s3913_s15, %s3848_s6  ;;  %p3854_p13 = scmp.lt.s32.totalorder %s3848_s6, %s3848_s6 }
  0x1c   :  { %p3855_p0 = por %p3854_p13, %p3853_p12 }
  0x1e   :  { %p3856_p1 = pnand %p3855_p0, %p3849_p11 }
  0x20   :  { %3859 = shalt.err (!%p3856_p1)
}
  0x21   :  { %s3890_s0 = smov 64   ;;  %s3891_s7 = smov 4  }
  0x22   :  { %32 = dma.hbm_to_vmem [thread:$0]  %s3960_s1, 32768, %s3913_s15, [#allocation6], %s3890_s0, %s3890_s0, %s3891_s7  }
  0x23   :  { %3882 = dma.done.wait [#allocation3], 2048  }
  0x24   :  { %3883 = vsyncadd [#allocation3], 4294965248 }
  0x25   :  { %3884 = dma.done.wait [#allocation6], 32768  }
  0x26   :  { %3885 = vsyncadd [#allocation6], 4294934528  ;;  %v3528_v0 = vld [vmem:[#allocation5 + $0x40] sm:$0xff]   ;;  %v3532_v4 = vld [vmem:[#allocation5 + $0x48] sm:$0xff]  }
  0x27   :  { %v3529_v1 = vld [vmem:[#allocation5 + $0xc0] sm:$0xff]   ;;  %3171 = vmatprep.subr.bf16.mxu0 %v3528_v0  ;;  %v3533_v5 = vld [vmem:[#allocation5 + $0xc8] sm:$0xff]   ;;  %v3536_v8 = vld [vmem:[#allocation5 + $0x50] sm:$0xff]  }
  0x28   :  { %v3530_v2 = vld [vmem:[#allocation5] sm:$0xff]   ;;  %3193 = vmatprep.subr.bf16.mxu1 %v3529_v1  ;;  %v3534_v6 = vld [vmem:[#allocation5 + $0x8] sm:$0xff]   ;;  %v3537_v9 = vld [vmem:[#allocation5 + $0xd0] sm:$0xff]  }
  0x29   :  { %v3531_v3 = vld [vmem:[#allocation5 + $0x80] sm:$0xff]   ;;  %3172 = vmatpush3.bf16.msra.mxu0 %v3530_v2  ;;  %v3535_v7 = vld [vmem:[#allocation5 + $0x88] sm:$0xff]   ;;  %v3538_v10 = vld [vmem:[#allocation5 + $0x10] sm:$0xff]  }
  0x2a   :  { %3194 = vmatpush3.bf16.msra.mxu1 %v3531_v3  ;;  %3173 = vmatprep.subr.bf16.mxu0 %v3532_v4  ;;  %v3539_v11 = vld [vmem:[#allocation5 + $0x90] sm:$0xff]   ;;  %v3540_v12 = vld [vmem:[#allocation5 + $0x58] sm:$0xff]   ;;  %v3544_v16 = vld [vmem:[#allocation5 + $0x60] sm:$0xff]  }
  0x2b   :  { %3195 = vmatprep.subr.bf16.mxu1 %v3533_v5  ;;  %v3541_v13 = vld [vmem:[#allocation5 + $0xd8] sm:$0xff]   ;;  %v3545_v17 = vld [vmem:[#allocation5 + $0xe0] sm:$0xff]   ;;  %v3548_v20 = vld [vmem:[#allocation5 + $0x68] sm:$0xff]  }
  0x2c   :  { %v3542_v14 = vld [vmem:[#allocation5 + $0x18] sm:$0xff]   ;;  %v3546_v18 = vld [vmem:[#allocation5 + $0x20] sm:$0xff]   ;;  %v3549_v21 = vld [vmem:[#allocation5 + $0xe8] sm:$0xff]  }
  0x2d   :  { %3174 = vmatpush3.bf16.msra.mxu0 %v3534_v6  ;;  %v3543_v15 = vld [vmem:[#allocation5 + $0x98] sm:$0xff]   ;;  %v3547_v19 = vld [vmem:[#allocation5 + $0xa0] sm:$0xff]   ;;  %v3550_v22 = vld [vmem:[#allocation5 + $0x28] sm:$0xff]  }
  0x2e   :  { %3196 = vmatpush3.bf16.msra.mxu1 %v3535_v7  ;;  %3175 = vmatprep.subr.bf16.mxu0 %v3536_v8  ;;  %v3551_v23 = vld [vmem:[#allocation5 + $0xa8] sm:$0xff]   ;;  %v3552_v24 = vld [vmem:[#allocation5 + $0x70] sm:$0xff]   ;;  %v3556_v28 = vld [vmem:[#allocation5 + $0x78] sm:$0xff]  }
  0x2f   :  { %3197 = vmatprep.subr.bf16.mxu1 %v3537_v9  ;;  %v3553_v25 = vld [vmem:[#allocation5 + $0xf0] sm:$0xff]   ;;  %v3557_v29 = vld [vmem:[#allocation5 + $0xf8] sm:$0xff]   ;;  %v42_v32 = vld [vmem:[#allocation2] sm:$0xff] }
  0x30   :  { %v3554_v26 = vld [vmem:[#allocation5 + $0x30] sm:$0xff]   ;;  %v3558_v30 = vld [vmem:[#allocation5 + $0x38] sm:$0xff]   ;;  %v43_v33 = vld [vmem:[#allocation2 + $0x8] sm:$0xff]  ;;  %v2883_v34 = vcombine.low %v42_v32, %v42_v32  ;;  %v2884_v35 = vcombine.high %v42_v32, %v42_v32 }
  0x31   :  { %3176 = vmatpush3.bf16.msra.mxu0 %v3538_v10  ;;  %v3555_v27 = vld [vmem:[#allocation5 + $0xb0] sm:$0xff]   ;;  %v3559_v31 = vld [vmem:[#allocation5 + $0xb8] sm:$0xff]   ;;  %v2885_v36 = vcombine.low %v43_v33, %v43_v33  ;;  %v2886_v37 = vcombine.high %v43_v33, %v43_v33  ;;  %v3564_v38 = vld [vmem:[#allocation5 + $0x140] sm:$0xff]  }
  0x32   :  { %3198 = vmatpush3.bf16.msra.mxu1 %v3539_v11  ;;  %3177 = vmatprep.subr.bf16.mxu0 %v3540_v12  ;;  %v3565_v39 = vld [vmem:[#allocation5 + $0x1c0] sm:$0xff]   ;;  %v3568_v42 = vld [vmem:[#allocation5 + $0x148] sm:$0xff]   ;;  %v3572_v46 = vld [vmem:[#allocation5 + $0x150] sm:$0xff]  }
  0x33   :  { %3199 = vmatprep.subr.bf16.mxu1 %v3541_v13  ;;  %2257 = vmatprep.mubr.bf16.mxu0 %v2884_v35  ;;  %v3566_v40 = vld [vmem:[#allocation5 + $0x100] sm:$0xff]   ;;  %v3569_v43 = vld [vmem:[#allocation5 + $0x1c8] sm:$0xff]   ;;  %v3573_v47 = vld [vmem:[#allocation5 + $0x1d0] sm:$0xff]  }
  0x34   :  { %2297 = vmatprep.mubr.bf16.mxu1 %v2886_v37  ;;  %v3567_v41 = vld [vmem:[#allocation5 + $0x180] sm:$0xff]   ;;  %v3570_v44 = vld [vmem:[#allocation5 + $0x108] sm:$0xff]   ;;  %v3574_v48 = vld [vmem:[#allocation5 + $0x110] sm:$0xff]  }
  0x35   :  { %3178 = vmatpush3.bf16.msra.mxu0 %v3542_v14  ;;  %v3571_v45 = vld [vmem:[#allocation5 + $0x188] sm:$0xff]   ;;  %v3575_v49 = vld [vmem:[#allocation5 + $0x190] sm:$0xff]   ;;  %v3576_v50 = vld [vmem:[#allocation5 + $0x158] sm:$0xff]  }
  0x36   :  { %3200 = vmatpush3.bf16.msra.mxu1 %v3543_v15  ;;  %3179 = vmatprep.subr.bf16.mxu0 %v3544_v16  ;;  %v3577_v51 = vld [vmem:[#allocation5 + $0x1d8] sm:$0xff]   ;;  %v3580_v54 = vld [vmem:[#allocation5 + $0x160] sm:$0xff]   ;;  %v3584_v58 = vld [vmem:[#allocation5 + $0x168] sm:$0xff]  }
  0x37   :  { %3201 = vmatprep.subr.bf16.mxu1 %v3545_v17  ;;  %v3578_v52 = vld [vmem:[#allocation5 + $0x118] sm:$0xff]   ;;  %v3581_v55 = vld [vmem:[#allocation5 + $0x1e0] sm:$0xff]   ;;  %v3585_v59 = vld [vmem:[#allocation5 + $0x1e8] sm:$0xff]  }
  0x38   :  { %v3579_v53 = vld [vmem:[#allocation5 + $0x198] sm:$0xff]   ;;  %v3582_v56 = vld [vmem:[#allocation5 + $0x120] sm:$0xff]   ;;  %v3586_v60 = vld [vmem:[#allocation5 + $0x128] sm:$0xff]  }
  0x39   :  { %3180 = vmatpush3.bf16.msra.mxu0 %v3546_v18  ;;  %v3583_v57 = vld [vmem:[#allocation5 + $0x1a0] sm:$0xff]   ;;  %v3587_v61 = vld [vmem:[#allocation5 + $0x1a8] sm:$0xff]   ;;  %v3588_v62 = vld [vmem:[#allocation5 + $0x170] sm:$0xff]  }
  0x3a   :  { %3202 = vmatpush3.bf16.msra.mxu1 %v3547_v19  ;;  %3181 = vmatprep.subr.bf16.mxu0 %v3548_v20  ;;  %v3589_v63 = vld [vmem:[#allocation5 + $0x1f0] sm:$0xff]   ;;  %v3592_v2 = vld [vmem:[#allocation5 + $0x178] sm:$0xff]   ;;  %v3600_v12 = vld [vmem:[#allocation5 + $0x240] sm:$0xff]  }
  0x3b   :  { %3203 = vmatprep.subr.bf16.mxu1 %v3549_v21  ;;  %v3590_v0 = vld [vmem:[#allocation5 + $0x130] sm:$0xff]   ;;  %v3593_v3 = vld [vmem:[#allocation5 + $0x1f8] sm:$0xff]   ;;  %v3601_v13 = vld [vmem:[#allocation5 + $0x2c0] sm:$0xff]  }
  0x3c   :  { %v3591_v1 = vld [vmem:[#allocation5 + $0x1b0] sm:$0xff]   ;;  %v3594_v4 = vld [vmem:[#allocation5 + $0x138] sm:$0xff]   ;;  %v3602_v14 = vld [vmem:[#allocation5 + $0x200] sm:$0xff]  }
  0x3d   :  { %3182 = vmatpush3.bf16.msra.mxu0 %v3550_v22  ;;  %v3595_v5 = vld [vmem:[#allocation5 + $0x1b8] sm:$0xff]   ;;  %v44_v6 = vld [vmem:[#allocation2 + $0x10] sm:$0xff]  ;;  %v3603_v15 = vld [vmem:[#allocation5 + $0x280] sm:$0xff]  }
  0x3e   :  { %3204 = vmatpush3.bf16.msra.mxu1 %v3551_v23  ;;  %3183 = vmatprep.subr.bf16.mxu0 %v3552_v24  ;;  %v2887_v7 = vcombine.low %v44_v6, %v44_v6  ;;  %v2888_v8 = vcombine.high %v44_v6, %v44_v6  ;;  %v45_v9 = vld [vmem:[#allocation2 + $0x18] sm:$0xff]  ;;  %v3604_v16 = vld [vmem:[#allocation5 + $0x248] sm:$0xff]   ;;  %v3608_v20 = vld [vmem:[#allocation5 + $0x250] sm:$0xff]  }
  0x3f   :  { %3205 = vmatprep.subr.bf16.mxu1 %v3553_v25  ;;  %v2889_v10 = vcombine.low %v45_v9, %v45_v9  ;;  %v2890_v11 = vcombine.high %v45_v9, %v45_v9  ;;  %v3605_v17 = vld [vmem:[#allocation5 + $0x2c8] sm:$0xff]   ;;  %v3609_v21 = vld [vmem:[#allocation5 + $0x2d0] sm:$0xff]   ;;  %v3612_v24 = vld [vmem:[#allocation5 + $0x258] sm:$0xff]  }
  0x40   :  { %v3606_v18 = vld [vmem:[#allocation5 + $0x208] sm:$0xff]   ;;  %v3610_v22 = vld [vmem:[#allocation5 + $0x210] sm:$0xff]   ;;  %v3613_v25 = vld [vmem:[#allocation5 + $0x2d8] sm:$0xff]  }
  0x41   :  { %3184 = vmatpush3.bf16.msra.mxu0 %v3554_v26  ;;  %v3607_v19 = vld [vmem:[#allocation5 + $0x288] sm:$0xff]   ;;  %v3611_v23 = vld [vmem:[#allocation5 + $0x290] sm:$0xff]   ;;  %v3614_v26 = vld [vmem:[#allocation5 + $0x218] sm:$0xff]  }
  0x42   :  { %3206 = vmatpush3.bf16.msra.mxu1 %v3555_v27  ;;  %3185 = vmatprep.subr.bf16.mxu0 %v3556_v28  ;;  %v3615_v27 = vld [vmem:[#allocation5 + $0x298] sm:$0xff]   ;;  %v3616_v28 = vld [vmem:[#allocation5 + $0x260] sm:$0xff]   ;;  %v3620_v32 = vld [vmem:[#allocation5 + $0x268] sm:$0xff]  }
  0x43   :  { %3207 = vmatprep.subr.bf16.mxu1 %v3557_v29  ;;  %v3617_v29 = vld [vmem:[#allocation5 + $0x2e0] sm:$0xff]   ;;  %v3621_v33 = vld [vmem:[#allocation5 + $0x2e8] sm:$0xff]   ;;  %v3625_v37 = vld [vmem:[#allocation5 + $0x2f0] sm:$0xff]  }
  0x44   :  { %v3623_v35 = vld [vmem:[#allocation5 + $0x2a8] sm:$0xff]  }
  0x45   :  { %3186 = vmatpush3.bf16.msra.mxu0 %v3558_v30  ;;  %v3618_v30 = vld [vmem:[#allocation5 + $0x220] sm:$0xff]   ;;  %v3656_v6 = vld [vmem:[#allocation5 + $0x368] sm:$0xff]  }
  0x46   :  { %3208 = vmatpush3.bf16.msra.mxu1 %v3559_v31  ;;  %3215 = vmatprep.subr.bf16.mxu0 %v3564_v38  ;;  %v3619_v31 = vld [vmem:[#allocation5 + $0x2a0] sm:$0xff]   ;;  %v3626_v38 = vld [vmem:[#allocation5 + $0x230] sm:$0xff]   ;;  %v3659_v9 = vld [vmem:[#allocation5 + $0x3a8] sm:$0xff]  }
  0x47   :  { %3237 = vmatprep.subr.bf16.mxu1 %v3565_v39  ;;  %v3627_v39 = vld [vmem:[#allocation5 + $0x2b0] sm:$0xff]  }
  0x48   :  { %2258 = vmatmul.mubr.bf16.vlgmr.msra.gmra.mrb[0].mxu0 %v2883_v34  ;;  %v3622_v34 = vld [vmem:[#allocation5 + $0x228] sm:$0xff]  }
  0x49   :  { %2298 = vmatmul.mubr.bf16.vlgmr.msra.gmra.mrb[0].mxu1 %v2885_v36  ;;  %3216 = vmatpush3.bf16.msra.mxu0 %v3566_v40  ;;  %v3624_v36 = vld [vmem:[#allocation5 + $0x270] sm:$0xff]   ;;  %v3628_v40 = vld [vmem:[#allocation5 + $0x278] sm:$0xff]  }
  0x4a   :  { %3238 = vmatpush3.bf16.msra.mxu1 %v3567_v41  ;;  %3217 = vmatprep.subr.bf16.mxu0 %v3568_v42  ;;  %v3629_v41 = vld [vmem:[#allocation5 + $0x2f8] sm:$0xff]  }
  0x4b   :  { %3239 = vmatprep.subr.bf16.mxu1 %v3569_v43  ;;  %2337 = vmatprep.mubr.bf16.mxu0 %v2888_v8  ;;  %v3630_v42 = vld [vmem:[#allocation5 + $0x238] sm:$0xff]   ;;  %v3658_v8 = vld [vmem:[#allocation5 + $0x328] sm:$0xff]  }
  0x4c   :  { %2377 = vmatprep.mubr.bf16.mxu1 %v2890_v11  ;;  %v3631_v43 = vld [vmem:[#allocation5 + $0x2b8] sm:$0xff]   ;;  %v3661_v11 = vld [vmem:[#allocation5 + $0x3f0] sm:$0xff]  }
  0x4d   :  { %3218 = vmatpush3.bf16.msra.mxu0 %v3570_v44  ;;  %v46_v44 = vld [vmem:[#allocation2 + $0x20] sm:$0xff] }
  0x4e   :  { %3240 = vmatpush3.bf16.msra.mxu1 %v3571_v45  ;;  %3219 = vmatprep.subr.bf16.mxu0 %v3572_v46  ;;  %v47_v45 = vld [vmem:[#allocation2 + $0x28] sm:$0xff]  ;;  %v2891_v46 = vcombine.low %v46_v44, %v46_v44 }
  0x4f   :  { %3241 = vmatprep.subr.bf16.mxu1 %v3573_v47  ;;  %v2892_v47 = vcombine.high %v46_v44, %v46_v44  ;;  %v3692_v44 = vld [vmem:[#allocation5 + $0x468] sm:$0xff]  }
  0x51   :  { %3220 = vmatpush3.bf16.msra.mxu0 %v3574_v48  ;;  %v2893_v48 = vcombine.low %v47_v45, %v47_v45 }
  0x52   :  { %3242 = vmatpush3.bf16.msra.mxu1 %v3575_v49  ;;  %3221 = vmatprep.subr.bf16.mxu0 %v3576_v50  ;;  %v2894_v49 = vcombine.high %v47_v45, %v47_v45  ;;  %v3636_v50 = vld [vmem:[#allocation5 + $0x340] sm:$0xff]   ;;  %v3693_v45 = vld [vmem:[#allocation5 + $0x4e8] sm:$0xff]  }
  0x53   :  { %3243 = vmatprep.subr.bf16.mxu1 %v3577_v51  ;;  %v3637_v51 = vld [vmem:[#allocation5 + $0x3c0] sm:$0xff]  }
  0x55   :  { %3222 = vmatpush3.bf16.msra.mxu0 %v3578_v52  ;;  %v3638_v52 = vld [vmem:[#allocation5 + $0x300] sm:$0xff]  }
  0x56   :  { %3244 = vmatpush3.bf16.msra.mxu1 %v3579_v53  ;;  %3223 = vmatprep.subr.bf16.mxu0 %v3580_v54  ;;  %v3639_v53 = vld [vmem:[#allocation5 + $0x380] sm:$0xff]   ;;  %v3640_v54 = vld [vmem:[#allocation5 + $0x348] sm:$0xff]  }
  0x57   :  { %3245 = vmatprep.subr.bf16.mxu1 %v3581_v55  ;;  %v3641_v55 = vld [vmem:[#allocation5 + $0x3c8] sm:$0xff]  }
  0x59   :  { %3224 = vmatpush3.bf16.msra.mxu0 %v3582_v56  ;;  %v3642_v56 = vld [vmem:[#allocation5 + $0x308] sm:$0xff]  }
  0x5a   :  { %3246 = vmatpush3.bf16.msra.mxu1 %v3583_v57  ;;  %3225 = vmatprep.subr.bf16.mxu0 %v3584_v58  ;;  %v3643_v57 = vld [vmem:[#allocation5 + $0x388] sm:$0xff]   ;;  %v3644_v58 = vld [vmem:[#allocation5 + $0x350] sm:$0xff]  }
  0x5b   :  { %3247 = vmatprep.subr.bf16.mxu1 %v3585_v59  ;;  %v3645_v59 = vld [vmem:[#allocation5 + $0x3d0] sm:$0xff]  }
  0x5d   :  { %3226 = vmatpush3.bf16.msra.mxu0 %v3586_v60  ;;  %v3646_v60 = vld [vmem:[#allocation5 + $0x310] sm:$0xff]  }
  0x5e   :  { %3248 = vmatpush3.bf16.msra.mxu1 %v3587_v61  ;;  %3227 = vmatprep.subr.bf16.mxu0 %v3588_v62  ;;  %v3647_v61 = vld [vmem:[#allocation5 + $0x390] sm:$0xff]   ;;  %v3648_v62 = vld [vmem:[#allocation5 + $0x358] sm:$0xff]  }
  0x5f   :  { %3249 = vmatprep.subr.bf16.mxu1 %v3589_v63  ;;  %v3649_v63 = vld [vmem:[#allocation5 + $0x3d8] sm:$0xff]  }
  0x61   :  { %3228 = vmatpush3.bf16.msra.mxu0 %v3590_v0  ;;  %v3650_v0 = vld [vmem:[#allocation5 + $0x318] sm:$0xff]  }
  0x62   :  { %3250 = vmatpush3.bf16.msra.mxu1 %v3591_v1  ;;  %3229 = vmatprep.subr.bf16.mxu0 %v3592_v2  ;;  %v3651_v1 = vld [vmem:[#allocation5 + $0x398] sm:$0xff]   ;;  %v3652_v2 = vld [vmem:[#allocation5 + $0x360] sm:$0xff]  }
  0x63   :  { %3251 = vmatprep.subr.bf16.mxu1 %v3593_v3  ;;  %v3653_v3 = vld [vmem:[#allocation5 + $0x3e0] sm:$0xff]  }
  0x65   :  { %3230 = vmatpush3.bf16.msra.mxu0 %v3594_v4  ;;  %v3654_v4 = vld [vmem:[#allocation5 + $0x320] sm:$0xff]  }
  0x66   :  { %3252 = vmatpush3.bf16.msra.mxu1 %v3595_v5  ;;  %3259 = vmatprep.subr.bf16.mxu0 %v3600_v12  ;;  %v3655_v5 = vld [vmem:[#allocation5 + $0x3a0] sm:$0xff]   ;;  %v3662_v12 = vld [vmem:[#allocation5 + $0x330] sm:$0xff]  }
  0x67   :  { %3281 = vmatprep.subr.bf16.mxu1 %v3601_v13  ;;  %v3663_v13 = vld [vmem:[#allocation5 + $0x3b0] sm:$0xff]  }
  0x68   :  { %2338 = vmatmul.mubr.bf16.vlgmr.msra.gmra.mrb[4].mxu0 %v2887_v7  ;;  %v3657_v7 = vld [vmem:[#allocation5 + $0x3e8] sm:$0xff]  }
  0x69   :  { %2378 = vmatmul.mubr.bf16.vlgmr.msra.gmra.mrb[4].mxu1 %v2889_v10  ;;  %3260 = vmatpush3.bf16.msra.mxu0 %v3602_v14  ;;  %v3660_v10 = vld [vmem:[#allocation5 + $0x370] sm:$0xff]   ;;  %v3664_v14 = vld [vmem:[#allocation5 + $0x378] sm:$0xff]  }
  0x6a   :  { %3282 = vmatpush3.bf16.msra.mxu1 %v3603_v15  ;;  %3261 = vmatprep.subr.bf16.mxu0 %v3604_v16  ;;  %v3665_v15 = vld [vmem:[#allocation5 + $0x3f8] sm:$0xff]  }
  0x6b   :  { %3283 = vmatprep.subr.bf16.mxu1 %v3605_v17  ;;  %2417 = vmatprep.mubr.bf16.mxu0 %v2892_v47  ;;  %v3666_v16 = vld [vmem:[#allocation5 + $0x338] sm:$0xff]   ;;  %v3695_v47 = vld [vmem:[#allocation5 + $0x4a8] sm:$0xff]  }
  0x6c   :  { %2457 = vmatprep.mubr.bf16.mxu1 %v2894_v49  ;;  %v3667_v17 = vld [vmem:[#allocation5 + $0x3b8] sm:$0xff]   ;;  %v3697_v49 = vld [vmem:[#allocation5 + $0x4f0] sm:$0xff]  }
  0x6d   :  { %3262 = vmatpush3.bf16.msra.mxu0 %v3606_v18  ;;  %v48_v18 = vld [vmem:[#allocation2 + $0x30] sm:$0xff] }
  0x6e   :  { %3284 = vmatpush3.bf16.msra.mxu1 %v3607_v19  ;;  %3263 = vmatprep.subr.bf16.mxu0 %v3608_v20  ;;  %v49_v19 = vld [vmem:[#allocation2 + $0x38] sm:$0xff]  ;;  %v2895_v20 = vcombine.low %v48_v18, %v48_v18 }
  0x6f   :  { %3285 = vmatprep.subr.bf16.mxu1 %v3609_v21  ;;  %v2896_v21 = vcombine.high %v48_v18, %v48_v18  ;;  %v3728_v18 = vld [vmem:[#allocation5 + $0x568] sm:$0xff]  }
  0x71   :  { %3264 = vmatpush3.bf16.msra.mxu0 %v3610_v22  ;;  %v2897_v22 = vcombine.low %v49_v19, %v49_v19 }
  0x72   :  { %3286 = vmatpush3.bf16.msra.mxu1 %v3611_v23  ;;  %3265 = vmatprep.subr.bf16.mxu0 %v3612_v24  ;;  %v3672_v23 = vld [vmem:[#allocation5 + $0x440] sm:$0xff]   ;;  %v2898_v24 = vcombine.high %v49_v19, %v49_v19  ;;  %v3729_v19 = vld [vmem:[#allocation5 + $0x5e8] sm:$0xff]  }
  0x73   :  { %3287 = vmatprep.subr.bf16.mxu1 %v3613_v25  ;;  %v3673_v25 = vld [vmem:[#allocation5 + $0x4c0] sm:$0xff]  }
  0x75   :  { %3266 = vmatpush3.bf16.msra.mxu0 %v3614_v26  ;;  %v3674_v26 = vld [vmem:[#allocation5 + $0x400] sm:$0xff]  }
  0x76   :  { %3288 = vmatpush3.bf16.msra.mxu1 %v3615_v27  ;;  %3267 = vmatprep.subr.bf16.mxu0 %v3616_v28  ;;  %v3675_v27 = vld [vmem:[#allocation5 + $0x480] sm:$0xff]   ;;  %v3676_v28 = vld [vmem:[#allocation5 + $0x448] sm:$0xff]  }
  0x77   :  { %3289 = vmatprep.subr.bf16.mxu1 %v3617_v29  ;;  %v3677_v29 = vld [vmem:[#allocation5 + $0x4c8] sm:$0xff]  }
  0x79   :  { %3268 = vmatpush3.bf16.msra.mxu0 %v3618_v30  ;;  %v3678_v30 = vld [vmem:[#allocation5 + $0x408] sm:$0xff]  }
  0x7a   :  { %3290 = vmatpush3.bf16.msra.mxu1 %v3619_v31  ;;  %3269 = vmatprep.subr.bf16.mxu0 %v3620_v32  ;;  %v3679_v31 = vld [vmem:[#allocation5 + $0x488] sm:$0xff]   ;;  %v3680_v32 = vld [vmem:[#allocation5 + $0x450] sm:$0xff]  }
  0x7b   :  { %3291 = vmatprep.subr.bf16.mxu1 %v3621_v33  ;;  %v3681_v33 = vld [vmem:[#allocation5 + $0x4d0] sm:$0xff]  }
  0x7d   :  { %3270 = vmatpush3.bf16.msra.mxu0 %v3622_v34  ;;  %v3682_v34 = vld [vmem:[#allocation5 + $0x410] sm:$0xff]  }
  0x7e   :  { %3292 = vmatpush3.bf16.msra.mxu1 %v3623_v35  ;;  %3271 = vmatprep.subr.bf16.mxu0 %v3624_v36  ;;  %v3683_v35 = vld [vmem:[#allocation5 + $0x490] sm:$0xff]   ;;  %v3684_v36 = vld [vmem:[#allocation5 + $0x458] sm:$0xff]  }
  0x7f   :  { %3293 = vmatprep.subr.bf16.mxu1 %v3625_v37  ;;  %v3685_v37 = vld [vmem:[#allocation5 + $0x4d8] sm:$0xff]  }
  0x81   :  { %3272 = vmatpush3.bf16.msra.mxu0 %v3626_v38  ;;  %v3686_v38 = vld [vmem:[#allocation5 + $0x418] sm:$0xff]  }
  0x82   :  { %3294 = vmatpush3.bf16.msra.mxu1 %v3627_v39  ;;  %3273 = vmatprep.subr.bf16.mxu0 %v3628_v40  ;;  %v3687_v39 = vld [vmem:[#allocation5 + $0x498] sm:$0xff]   ;;  %v3688_v40 = vld [vmem:[#allocation5 + $0x460] sm:$0xff]  }
  0x83   :  { %3295 = vmatprep.subr.bf16.mxu1 %v3629_v41  ;;  %v3689_v41 = vld [vmem:[#allocation5 + $0x4e0] sm:$0xff]  }
  0x85   :  { %3274 = vmatpush3.bf16.msra.mxu0 %v3630_v42  ;;  %v3690_v42 = vld [vmem:[#allocation5 + $0x420] sm:$0xff]  }
  0x86   :  { %3296 = vmatpush3.bf16.msra.mxu1 %v3631_v43  ;;  %3303 = vmatprep.subr.bf16.mxu0 %v3636_v50  ;;  %v3691_v43 = vld [vmem:[#allocation5 + $0x4a0] sm:$0xff]   ;;  %v3698_v50 = vld [vmem:[#allocation5 + $0x430] sm:$0xff]  }
  0x87   :  { %3325 = vmatprep.subr.bf16.mxu1 %v3637_v51  ;;  %v3699_v51 = vld [vmem:[#allocation5 + $0x4b0] sm:$0xff]  }
  0x88   :  { %2418 = vmatmul.mubr.bf16.vlgmr.msra.gmra.mrb[8].mxu0 %v2891_v46  ;;  %v3694_v46 = vld [vmem:[#allocation5 + $0x428] sm:$0xff]  }
  0x89   :  { %2458 = vmatmul.mubr.bf16.vlgmr.msra.gmra.mrb[8].mxu1 %v2893_v48  ;;  %3304 = vmatpush3.bf16.msra.mxu0 %v3638_v52  ;;  %v3696_v48 = vld [vmem:[#allocation5 + $0x470] sm:$0xff]   ;;  %v3700_v52 = vld [vmem:[#allocation5 + $0x478] sm:$0xff]  }
  0x8a   :  { %3326 = vmatpush3.bf16.msra.mxu1 %v3639_v53  ;;  %3305 = vmatprep.subr.bf16.mxu0 %v3640_v54  ;;  %v3701_v53 = vld [vmem:[#allocation5 + $0x4f8] sm:$0xff]  }
  0x8b   :  { %3327 = vmatprep.subr.bf16.mxu1 %v3641_v55  ;;  %2497 = vmatprep.mubr.bf16.mxu0 %v2896_v21  ;;  %v3702_v54 = vld [vmem:[#allocation5 + $0x438] sm:$0xff]   ;;  %v3731_v21 = vld [vmem:[#allocation5 + $0x5a8] sm:$0xff]  }
  0x8c   :  { %2537 = vmatprep.mubr.bf16.mxu1 %v2898_v24  ;;  %v3703_v55 = vld [vmem:[#allocation5 + $0x4b8] sm:$0xff]   ;;  %v3734_v24 = vld [vmem:[#allocation5 + $0x530] sm:$0xff]  }
  0x8d   :  { %3306 = vmatpush3.bf16.msra.mxu0 %v3642_v56  ;;  %v50_v56 = vld [vmem:[#allocation2 + $0x40] sm:$0xff] }
  0x8e   :  { %3328 = vmatpush3.bf16.msra.mxu1 %v3643_v57  ;;  %3307 = vmatprep.subr.bf16.mxu0 %v3644_v58  ;;  %v2899_v57 = vcombine.low %v50_v56, %v50_v56  ;;  %v2900_v58 = vcombine.high %v50_v56, %v50_v56  ;;  %v3764_v56 = vld [vmem:[#allocation5 + $0x668] sm:$0xff]  }
  0x8f   :  { %3329 = vmatprep.subr.bf16.mxu1 %v3645_v59  ;;  %v51_v59 = vld [vmem:[#allocation2 + $0x48] sm:$0xff] }
  0x91   :  { %3308 = vmatpush3.bf16.msra.mxu0 %v3646_v60  ;;  %v2901_v60 = vcombine.low %v51_v59, %v51_v59 }
  0x92   :  { %3330 = vmatpush3.bf16.msra.mxu1 %v3647_v61  ;;  %3309 = vmatprep.subr.bf16.mxu0 %v3648_v62  ;;  %v2902_v61 = vcombine.high %v51_v59, %v51_v59  ;;  %v3708_v62 = vld [vmem:[#allocation5 + $0x540] sm:$0xff]   ;;  %v3767_v59 = vld [vmem:[#allocation5 + $0x6a8] sm:$0xff]  }
  0x93   :  { %3331 = vmatprep.subr.bf16.mxu1 %v3649_v63  ;;  %v3709_v63 = vld [vmem:[#allocation5 + $0x5c0] sm:$0xff]  }
  0x95   :  { %3310 = vmatpush3.bf16.msra.mxu0 %v3650_v0  ;;  %v3710_v0 = vld [vmem:[#allocation5 + $0x500] sm:$0xff]  }
  0x96   :  { %3332 = vmatpush3.bf16.msra.mxu1 %v3651_v1  ;;  %3311 = vmatprep.subr.bf16.mxu0 %v3652_v2  ;;  %v3711_v1 = vld [vmem:[#allocation5 + $0x580] sm:$0xff]   ;;  %v3712_v2 = vld [vmem:[#allocation5 + $0x548] sm:$0xff]  }
  0x97   :  { %3333 = vmatprep.subr.bf16.mxu1 %v3653_v3  ;;  %v3713_v3 = vld [vmem:[#allocation5 + $0x5c8] sm:$0xff]  }
  0x99   :  { %3312 = vmatpush3.bf16.msra.mxu0 %v3654_v4  ;;  %v3714_v4 = vld [vmem:[#allocation5 + $0x508] sm:$0xff]  }
  0x9a   :  { %3334 = vmatpush3.bf16.msra.mxu1 %v3655_v5  ;;  %3313 = vmatprep.subr.bf16.mxu0 %v3656_v6  ;;  %v3715_v5 = vld [vmem:[#allocation5 + $0x588] sm:$0xff]   ;;  %v3716_v6 = vld [vmem:[#allocation5 + $0x550] sm:$0xff]  }
  0x9b   :  { %3335 = vmatprep.subr.bf16.mxu1 %v3657_v7  ;;  %v3717_v7 = vld [vmem:[#allocation5 + $0x5d0] sm:$0xff]  }
  0x9d   :  { %3314 = vmatpush3.bf16.msra.mxu0 %v3658_v8  ;;  %v3718_v8 = vld [vmem:[#allocation5 + $0x510] sm:$0xff]  }
  0x9e   :  { %3336 = vmatpush3.bf16.msra.mxu1 %v3659_v9  ;;  %3315 = vmatprep.subr.bf16.mxu0 %v3660_v10  ;;  %v3719_v9 = vld [vmem:[#allocation5 + $0x590] sm:$0xff]   ;;  %v3720_v10 = vld [vmem:[#allocation5 + $0x558] sm:$0xff]  }
  0x9f   :  { %3337 = vmatprep.subr.bf16.mxu1 %v3661_v11  ;;  %v3721_v11 = vld [vmem:[#allocation5 + $0x5d8] sm:$0xff]  }
  0xa1   :  { %3316 = vmatpush3.bf16.msra.mxu0 %v3662_v12  ;;  %v3722_v12 = vld [vmem:[#allocation5 + $0x518] sm:$0xff]  }
  0xa2   :  { %3338 = vmatpush3.bf16.msra.mxu1 %v3663_v13  ;;  %3317 = vmatprep.subr.bf16.mxu0 %v3664_v14  ;;  %v3723_v13 = vld [vmem:[#allocation5 + $0x598] sm:$0xff]   ;;  %v3724_v14 = vld [vmem:[#allocation5 + $0x560] sm:$0xff]  }
  0xa3   :  { %3339 = vmatprep.subr.bf16.mxu1 %v3665_v15  ;;  %v3725_v15 = vld [vmem:[#allocation5 + $0x5e0] sm:$0xff]  }
  0xa5   :  { %3318 = vmatpush3.bf16.msra.mxu0 %v3666_v16  ;;  %v3726_v16 = vld [vmem:[#allocation5 + $0x520] sm:$0xff]  }
  0xa6   :  { %3340 = vmatpush3.bf16.msra.mxu1 %v3667_v17  ;;  %3347 = vmatprep.subr.bf16.mxu0 %v3672_v23  ;;  %v3727_v17 = vld [vmem:[#allocation5 + $0x5a0] sm:$0xff]   ;;  %v3733_v23 = vld [vmem:[#allocation5 + $0x5f0] sm:$0xff]  }
  0xa7   :  { %3369 = vmatprep.subr.bf16.mxu1 %v3673_v25  ;;  %v3735_v25 = vld [vmem:[#allocation5 + $0x5b0] sm:$0xff]  }
  0xa8   :  { %2498 = vmatmul.mubr.bf16.vlgmr.msra.gmra.mrb[12].mxu0 %v2895_v20  ;;  %v3730_v20 = vld [vmem:[#allocation5 + $0x528] sm:$0xff]  }
  0xa9   :  { %2538 = vmatmul.mubr.bf16.vlgmr.msra.gmra.mrb[12].mxu1 %v2897_v22  ;;  %3348 = vmatpush3.bf16.msra.mxu0 %v3674_v26  ;;  %v3732_v22 = vld [vmem:[#allocation5 + $0x570] sm:$0xff]   ;;  %v3736_v26 = vld [vmem:[#allocation5 + $0x578] sm:$0xff]  }
  0xaa   :  { %3370 = vmatpush3.bf16.msra.mxu1 %v3675_v27  ;;  %3349 = vmatprep.subr.bf16.mxu0 %v3676_v28  ;;  %v3737_v27 = vld [vmem:[#allocation5 + $0x5f8] sm:$0xff]  }
  0xab   :  { %3371 = vmatprep.subr.bf16.mxu1 %v3677_v29  ;;  %2577 = vmatprep.mubr.bf16.mxu0 %v2900_v58  ;;  %v3738_v28 = vld [vmem:[#allocation5 + $0x538] sm:$0xff]   ;;  %v3766_v58 = vld [vmem:[#allocation5 + $0x628] sm:$0xff]  }
  0xac   :  { %2617 = vmatprep.mubr.bf16.mxu1 %v2902_v61  ;;  %v3739_v29 = vld [vmem:[#allocation5 + $0x5b8] sm:$0xff]   ;;  %v3769_v61 = vld [vmem:[#allocation5 + $0x6f0] sm:$0xff]  }
  0xad   :  { %3350 = vmatpush3.bf16.msra.mxu0 %v3678_v30  ;;  %v52_v30 = vld [vmem:[#allocation2 + $0x50] sm:$0xff] }
  0xae   :  { %3372 = vmatpush3.bf16.msra.mxu1 %v3679_v31  ;;  %3351 = vmatprep.subr.bf16.mxu0 %v3680_v32  ;;  %v53_v31 = vld [vmem:[#allocation2 + $0x58] sm:$0xff]  ;;  %v2903_v32 = vcombine.low %v52_v30, %v52_v30 }
  0xaf   :  { %3373 = vmatprep.subr.bf16.mxu1 %v3681_v33  ;;  %v2904_v33 = vcombine.high %v52_v30, %v52_v30  ;;  %v3799_v30 = vld [vmem:[#allocation5 + $0x7a0] sm:$0xff]  }
  0xb1   :  { %3352 = vmatpush3.bf16.msra.mxu0 %v3682_v34  ;;  %v2905_v34 = vcombine.low %v53_v31, %v53_v31 }
  0xb2   :  { %3374 = vmatpush3.bf16.msra.mxu1 %v3683_v35  ;;  %3353 = vmatprep.subr.bf16.mxu0 %v3684_v36  ;;  %v2906_v35 = vcombine.high %v53_v31, %v53_v31  ;;  %v3744_v36 = vld [vmem:[#allocation5 + $0x640] sm:$0xff]  }
  0xb3   :  { %3375 = vmatprep.subr.bf16.mxu1 %v3685_v37  ;;  %v3745_v37 = vld [vmem:[#allocation5 + $0x6c0] sm:$0xff]  }
  0xb5   :  { %3354 = vmatpush3.bf16.msra.mxu0 %v3686_v38  ;;  %v3746_v38 = vld [vmem:[#allocation5 + $0x600] sm:$0xff]  }
  0xb6   :  { %3376 = vmatpush3.bf16.msra.mxu1 %v3687_v39  ;;  %3355 = vmatprep.subr.bf16.mxu0 %v3688_v40  ;;  %v3747_v39 = vld [vmem:[#allocation5 + $0x680] sm:$0xff]   ;;  %v3748_v40 = vld [vmem:[#allocation5 + $0x648] sm:$0xff]  }
  0xb7   :  { %3377 = vmatprep.subr.bf16.mxu1 %v3689_v41  ;;  %v3749_v41 = vld [vmem:[#allocation5 + $0x6c8] sm:$0xff]  }
  0xb9   :  { %3356 = vmatpush3.bf16.msra.mxu0 %v3690_v42  ;;  %v3750_v42 = vld [vmem:[#allocation5 + $0x608] sm:$0xff]  }
  0xba   :  { %3378 = vmatpush3.bf16.msra.mxu1 %v3691_v43  ;;  %3357 = vmatprep.subr.bf16.mxu0 %v3692_v44  ;;  %v3751_v43 = vld [vmem:[#allocation5 + $0x688] sm:$0xff]   ;;  %v3752_v44 = vld [vmem:[#allocation5 + $0x650] sm:$0xff]  }
  0xbb   :  { %3379 = vmatprep.subr.bf16.mxu1 %v3693_v45  ;;  %v3753_v45 = vld [vmem:[#allocation5 + $0x6d0] sm:$0xff]  }
  0xbd   :  { %3358 = vmatpush3.bf16.msra.mxu0 %v3694_v46  ;;  %v3754_v46 = vld [vmem:[#allocation5 + $0x610] sm:$0xff]  }
  0xbe   :  { %3380 = vmatpush3.bf16.msra.mxu1 %v3695_v47  ;;  %3359 = vmatprep.subr.bf16.mxu0 %v3696_v48  ;;  %v3755_v47 = vld [vmem:[#allocation5 + $0x690] sm:$0xff]   ;;  %v3756_v48 = vld [vmem:[#allocation5 + $0x658] sm:$0xff]  }
  0xbf   :  { %3381 = vmatprep.subr.bf16.mxu1 %v3697_v49  ;;  %v3757_v49 = vld [vmem:[#allocation5 + $0x6d8] sm:$0xff]  }
  0xc1   :  { %3360 = vmatpush3.bf16.msra.mxu0 %v3698_v50  ;;  %v3758_v50 = vld [vmem:[#allocation5 + $0x618] sm:$0xff]  }
  0xc2   :  { %3382 = vmatpush3.bf16.msra.mxu1 %v3699_v51  ;;  %3361 = vmatprep.subr.bf16.mxu0 %v3700_v52  ;;  %v3759_v51 = vld [vmem:[#allocation5 + $0x698] sm:$0xff]   ;;  %v3760_v52 = vld [vmem:[#allocation5 + $0x660] sm:$0xff]  }
  0xc3   :  { %3383 = vmatprep.subr.bf16.mxu1 %v3701_v53  ;;  %v3761_v53 = vld [vmem:[#allocation5 + $0x6e0] sm:$0xff]  }
  0xc5   :  { %3362 = vmatpush3.bf16.msra.mxu0 %v3702_v54  ;;  %v3762_v54 = vld [vmem:[#allocation5 + $0x620] sm:$0xff]  }
  0xc6   :  { %3384 = vmatpush3.bf16.msra.mxu1 %v3703_v55  ;;  %3391 = vmatprep.subr.bf16.mxu0 %v3708_v62  ;;  %v3763_v55 = vld [vmem:[#allocation5 + $0x6a0] sm:$0xff]   ;;  %v3770_v62 = vld [vmem:[#allocation5 + $0x630] sm:$0xff]  }
  0xc7   :  { %3413 = vmatprep.subr.bf16.mxu1 %v3709_v63  ;;  %v3771_v63 = vld [vmem:[#allocation5 + $0x6b0] sm:$0xff]  }
  0xc8   :  { %2578 = vmatmul.mubr.bf16.vlgmr.msra.gmra.mrb[16].mxu0 %v2899_v57  ;;  %v3765_v57 = vld [vmem:[#allocation5 + $0x6e8] sm:$0xff]  }
  0xc9   :  { %2618 = vmatmul.mubr.bf16.vlgmr.msra.gmra.mrb[16].mxu1 %v2901_v60  ;;  %3392 = vmatpush3.bf16.msra.mxu0 %v3710_v0  ;;  %v3768_v60 = vld [vmem:[#allocation5 + $0x670] sm:$0xff]   ;;  %v3772_v0 = vld [vmem:[#allocation5 + $0x678] sm:$0xff]  }
  0xca   :  { %3414 = vmatpush3.bf16.msra.mxu1 %v3711_v1  ;;  %3393 = vmatprep.subr.bf16.mxu0 %v3712_v2  ;;  %v3773_v1 = vld [vmem:[#allocation5 + $0x6f8] sm:$0xff]  }
  0xcb   :  { %3415 = vmatprep.subr.bf16.mxu1 %v3713_v3  ;;  %2657 = vmatprep.mubr.bf16.mxu0 %v2904_v33  ;;  %v3774_v2 = vld [vmem:[#allocation5 + $0x638] sm:$0xff]  }
  0xcc   :  { %2697 = vmatprep.mubr.bf16.mxu1 %v2906_v35  ;;  %v3775_v3 = vld [vmem:[#allocation5 + $0x6b8] sm:$0xff]  }
  0xcd   :  { %3394 = vmatpush3.bf16.msra.mxu0 %v3714_v4  ;;  %v54_v4 = vld [vmem:[#allocation2 + $0x60] sm:$0xff] }
  0xce   :  { %3416 = vmatpush3.bf16.msra.mxu1 %v3715_v5  ;;  %3395 = vmatprep.subr.bf16.mxu0 %v3716_v6  ;;  %v55_v5 = vld [vmem:[#allocation2 + $0x68] sm:$0xff]  ;;  %v2907_v6 = vcombine.low %v54_v4, %v54_v4 }
  0xcf   :  { %3417 = vmatprep.subr.bf16.mxu1 %v3717_v7  ;;  %v2908_v7 = vcombine.high %v54_v4, %v54_v4 }
  0xd1   :  { %3396 = vmatpush3.bf16.msra.mxu0 %v3718_v8  ;;  %v2909_v8 = vcombine.low %v55_v5, %v55_v5 }
  0xd2   :  { %3418 = vmatpush3.bf16.msra.mxu1 %v3719_v9  ;;  %3397 = vmatprep.subr.bf16.mxu0 %v3720_v10  ;;  %v3780_v9 = vld [vmem:[#allocation5 + $0x740] sm:$0xff]   ;;  %v2910_v10 = vcombine.high %v55_v5, %v55_v5 }
  0xd3   :  { %3419 = vmatprep.subr.bf16.mxu1 %v3721_v11  ;;  %v3781_v11 = vld [vmem:[#allocation5 + $0x7c0] sm:$0xff]  }
  0xd5   :  { %3398 = vmatpush3.bf16.msra.mxu0 %v3722_v12  ;;  %v3782_v12 = vld [vmem:[#allocation5 + $0x700] sm:$0xff]  }
  0xd6   :  { %3420 = vmatpush3.bf16.msra.mxu1 %v3723_v13  ;;  %3399 = vmatprep.subr.bf16.mxu0 %v3724_v14  ;;  %v3783_v13 = vld [vmem:[#allocation5 + $0x780] sm:$0xff]   ;;  %v3784_v14 = vld [vmem:[#allocation5 + $0x748] sm:$0xff]  }
  0xd7   :  { %3421 = vmatprep.subr.bf16.mxu1 %v3725_v15  ;;  %v3785_v15 = vld [vmem:[#allocation5 + $0x7c8] sm:$0xff]  }
  0xd9   :  { %3400 = vmatpush3.bf16.msra.mxu0 %v3726_v16  ;;  %v3786_v16 = vld [vmem:[#allocation5 + $0x708] sm:$0xff]  }
  0xda   :  { %3422 = vmatpush3.bf16.msra.mxu1 %v3727_v17  ;;  %3401 = vmatprep.subr.bf16.mxu0 %v3728_v18  ;;  %v3787_v17 = vld [vmem:[#allocation5 + $0x788] sm:$0xff]   ;;  %v3788_v18 = vld [vmem:[#allocation5 + $0x750] sm:$0xff]  }
  0xdb   :  { %3423 = vmatprep.subr.bf16.mxu1 %v3729_v19  ;;  %v3789_v19 = vld [vmem:[#allocation5 + $0x7d0] sm:$0xff]  }
  0xdd   :  { %3402 = vmatpush3.bf16.msra.mxu0 %v3730_v20  ;;  %v3790_v20 = vld [vmem:[#allocation5 + $0x710] sm:$0xff]  }
  0xde   :  { %3424 = vmatpush3.bf16.msra.mxu1 %v3731_v21  ;;  %3403 = vmatprep.subr.bf16.mxu0 %v3732_v22  ;;  %v3791_v21 = vld [vmem:[#allocation5 + $0x790] sm:$0xff]   ;;  %v3792_v22 = vld [vmem:[#allocation5 + $0x758] sm:$0xff]  }
  0xdf   :  { %3425 = vmatprep.subr.bf16.mxu1 %v3733_v23  ;;  %v3793_v23 = vld [vmem:[#allocation5 + $0x7d8] sm:$0xff]  }
  0xe1   :  { %3404 = vmatpush3.bf16.msra.mxu0 %v3734_v24  ;;  %v3794_v24 = vld [vmem:[#allocation5 + $0x718] sm:$0xff]  }
  0xe2   :  { %3426 = vmatpush3.bf16.msra.mxu1 %v3735_v25  ;;  %3405 = vmatprep.subr.bf16.mxu0 %v3736_v26  ;;  %v3795_v25 = vld [vmem:[#allocation5 + $0x798] sm:$0xff]   ;;  %v3796_v26 = vld [vmem:[#allocation5 + $0x760] sm:$0xff]  }
  0xe3   :  { %3427 = vmatprep.subr.bf16.mxu1 %v3737_v27  ;;  %v3797_v27 = vld [vmem:[#allocation5 + $0x7e0] sm:$0xff]  }
  0xe5   :  { %3406 = vmatpush3.bf16.msra.mxu0 %v3738_v28  ;;  %v3798_v28 = vld [vmem:[#allocation5 + $0x720] sm:$0xff]  }
  0xe6   :  { %3428 = vmatpush3.bf16.msra.mxu1 %v3739_v29  ;;  %3435 = vmatprep.subr.bf16.mxu0 %v3744_v36 }
  0xe7   :  { %3457 = vmatprep.subr.bf16.mxu1 %v3745_v37  ;;  %v3800_v37 = vld [vmem:[#allocation5 + $0x768] sm:$0xff]  }
  0xe8   :  { %2658 = vmatmul.mubr.bf16.vlgmr.msra.gmra.mrb[20].mxu0 %v2903_v32  ;;  %v2882_v32 = vld [vmem:[%s3961_s2] ss:$0 sm:$0xff]  ;;  %s3892_s2 = smov [#allocation7]  }
  0xe9   :  { %2698 = vmatmul.mubr.bf16.vlgmr.msra.gmra.mrb[20].mxu1 %v2905_v34  ;;  %3436 = vmatpush3.bf16.msra.mxu0 %v3746_v38  ;;  %s2872_s11 = sshll.u32 %s3892_s2, 4  ;;  %s2873_s11 = int_to_ptr.vmem [resolvable:$true] %s2872_s11 }
  0xea   :  { %3458 = vmatpush3.bf16.msra.mxu1 %v3747_v39  ;;  %3437 = vmatprep.subr.bf16.mxu0 %v3748_v40  ;;  %v3801_v39 = vld [vmem:[#allocation5 + $0x7e8] sm:$0xff]   ;;  %s3860_s12 = scalar_lea.vmem %s2873_s11, 128  ;;  %p3865_p3 = scmp.lt.s32.totalorder %s2873_s11, %s2873_s11 }
  0xeb   :  { %3459 = vmatprep.subr.bf16.mxu1 %v3749_v41  ;;  %2737 = vmatprep.mubr.bf16.mxu0 %v2908_v7  ;;  %p3861_p2 = scmp.ne.s32.totalorder %s2873_s11, %s3860_s12  ;;  %p3866_p4 = scmp.lt.s32.totalorder %s3860_s12, %s3860_s12 }
  0xec   :  { %2777 = vmatprep.mubr.bf16.mxu1 %v2910_v10 }
  0xed   :  { %3438 = vmatpush3.bf16.msra.mxu0 %v3750_v42  ;;  %v3802_v42 = vld [vmem:[#allocation5 + $0x728] sm:$0xff]   ;;  %p3867_p5 = por %p3866_p4, %p3865_p3 }
  0xee   :  { %3460 = vmatpush3.bf16.msra.mxu1 %v3751_v43  ;;  %3439 = vmatprep.subr.bf16.mxu0 %v3752_v44  ;;  %v3803_v44 = vld [vmem:[#allocation5 + $0x7a8] sm:$0xff]  }
  0xef   :  { %3461 = vmatprep.subr.bf16.mxu1 %v3753_v45  ;;  %p3868_p6 = pnand %p3867_p5, %p3861_p2 }
  0xf1   :  { %3440 = vmatpush3.bf16.msra.mxu0 %v3754_v46 }
  0xf2   :  { %3462 = vmatpush3.bf16.msra.mxu1 %v3755_v47  ;;  %3441 = vmatprep.subr.bf16.mxu0 %v3756_v48  ;;  %v3804_v47 = vld [vmem:[#allocation5 + $0x770] sm:$0xff]  }
  0xf3   :  { %3463 = vmatprep.subr.bf16.mxu1 %v3757_v49  ;;  %v3805_v48 = vld [vmem:[#allocation5 + $0x7f0] sm:$0xff]  }
  0xf4   :  { %v3806_v49 = vld [vmem:[#allocation5 + $0x730] sm:$0xff]  }
  0xf5   :  { %3442 = vmatpush3.bf16.msra.mxu0 %v3758_v50  ;;  %v3807_v50 = vld [vmem:[#allocation5 + $0x7b0] sm:$0xff]  }
  0xf6   :  { %3464 = vmatpush3.bf16.msra.mxu1 %v3759_v51  ;;  %3443 = vmatprep.subr.bf16.mxu0 %v3760_v52  ;;  %v3808_v51 = vld [vmem:[#allocation5 + $0x778] sm:$0xff]  }
  0xf7   :  { %3465 = vmatprep.subr.bf16.mxu1 %v3761_v53  ;;  %v3809_v52 = vld [vmem:[#allocation5 + $0x7f8] sm:$0xff]  }
  0xf8   :  { %v3810_v53 = vld [vmem:[#allocation5 + $0x738] sm:$0xff]  }
  0xf9   :  { %3444 = vmatpush3.bf16.msra.mxu0 %v3762_v54  ;;  %v3811_v54 = vld [vmem:[#allocation5 + $0x7b8] sm:$0xff]  }
  0xfa   :  { %3466 = vmatpush3.bf16.msra.mxu1 %v3763_v55  ;;  %3445 = vmatprep.subr.bf16.mxu0 %v3764_v56  ;;  %v56_v55 = vld [vmem:[#allocation2 + $0x70] sm:$0xff]  ;;  %v57_v56 = vld [vmem:[#allocation2 + $0x78] sm:$0xff] }
  0xfb   :  { %3467 = vmatprep.subr.bf16.mxu1 %v3765_v57  ;;  %v2911_v57 = vcombine.low %v56_v55, %v56_v55 }
  0xfd   :  { %3446 = vmatpush3.bf16.msra.mxu0 %v3766_v58  ;;  %v2912_v58 = vcombine.high %v56_v55, %v56_v55 }
  0xfe   :  { %3468 = vmatpush3.bf16.msra.mxu1 %v3767_v59  ;;  %3447 = vmatprep.subr.bf16.mxu0 %v3768_v60  ;;  %v2913_v59 = vcombine.low %v57_v56, %v57_v56  ;;  %v2914_v60 = vcombine.high %v57_v56, %v57_v56 }
  0xff   :  { %3469 = vmatprep.subr.bf16.mxu1 %v3769_v61 }
 0x101   :  { %3448 = vmatpush3.bf16.msra.mxu0 %v3770_v62 }
 0x102   :  { %3470 = vmatpush3.bf16.msra.mxu1 %v3771_v63  ;;  %3449 = vmatprep.subr.bf16.mxu0 %v3772_v0 }
 0x103   :  { %3471 = vmatprep.subr.bf16.mxu1 %v3773_v1 }
 0x105   :  { %3450 = vmatpush3.bf16.msra.mxu0 %v3774_v2 }
 0x106   :  { %3472 = vmatpush3.bf16.msra.mxu1 %v3775_v3  ;;  %3479 = vmatprep.subr.bf16.mxu0 %v3780_v9 }
 0x107   :  { %3501 = vmatprep.subr.bf16.mxu1 %v3781_v11 }
 0x108   :  { %2738 = vmatmul.mubr.bf16.vlgmr.msra.gmra.mrb[24].mxu0 %v2907_v6 }
 0x109   :  { %2778 = vmatmul.mubr.bf16.vlgmr.msra.gmra.mrb[24].mxu1 %v2909_v8  ;;  %3480 = vmatpush3.bf16.msra.mxu0 %v3782_v12 }
 0x10a   :  { %3502 = vmatpush3.bf16.msra.mxu1 %v3783_v13  ;;  %3481 = vmatprep.subr.bf16.mxu0 %v3784_v14 }
 0x10b   :  { %3503 = vmatprep.subr.bf16.mxu1 %v3785_v15  ;;  %2817 = vmatprep.mubr.bf16.mxu0 %v2912_v58 }
 0x10c   :  { %2857 = vmatprep.mubr.bf16.mxu1 %v2914_v60 }
 0x10d   :  { %3482 = vmatpush3.bf16.msra.mxu0 %v3786_v16 }
 0x10e   :  { %3504 = vmatpush3.bf16.msra.mxu1 %v3787_v17  ;;  %3483 = vmatprep.subr.bf16.mxu0 %v3788_v18 }
 0x10f   :  { %3505 = vmatprep.subr.bf16.mxu1 %v3789_v19 }
 0x111   :  { %3484 = vmatpush3.bf16.msra.mxu0 %v3790_v20 }
 0x112   :  { %3506 = vmatpush3.bf16.msra.mxu1 %v3791_v21  ;;  %3485 = vmatprep.subr.bf16.mxu0 %v3792_v22 }
 0x113   :  { %3507 = vmatprep.subr.bf16.mxu1 %v3793_v23 }
 0x115   :  { %3486 = vmatpush3.bf16.msra.mxu0 %v3794_v24 }
 0x116   :  { %3508 = vmatpush3.bf16.msra.mxu1 %v3795_v25  ;;  %3487 = vmatprep.subr.bf16.mxu0 %v3796_v26 }
 0x117   :  { %3509 = vmatprep.subr.bf16.mxu1 %v3797_v27 }
 0x119   :  { %3488 = vmatpush3.bf16.msra.mxu0 %v3798_v28 }
 0x11a   :  { %3510 = vmatpush3.bf16.msra.mxu1 %v3799_v30  ;;  %3489 = vmatprep.subr.bf16.mxu0 %v3800_v37 }
 0x11b   :  { %v3187_v29 = vpop.f32.mrb[0].mxu0  ;;  %3511 = vmatprep.subr.bf16.mxu1 %v3801_v39 }
 0x11c   :  { %v3209_v31 = vpop.f32.mrb[0].mxu1  ;;  %v3188_v33 = vpop.f32.mrb[1].mxu0 }
 0x11d   :  { %v3210_v34 = vpop.f32.mrb[1].mxu1  ;;  %v3189_v35 = vadd.f32 %v3188_v33, %v3187_v29  ;;  %v3190_v38 = vpop.f32.mrb[2].mxu0  ;;  %3490 = vmatpush3.bf16.msra.mxu0 %v3802_v42 }
 0x11e   :  { %v3211_v36 = vadd.f32 %v3210_v34, %v3209_v31  ;;  %v3212_v40 = vpop.f32.mrb[2].mxu1  ;;  %v3191_v43 = vpop.f32.mrb[3].mxu0  ;;  %3512 = vmatpush3.bf16.msra.mxu1 %v3803_v44  ;;  %3491 = vmatprep.subr.bf16.mxu0 %v3804_v47 }
 0x11f   :  { %v2260_v41 = vadd.f32 %v3189_v35, %v2882_v32  ;;  %v3213_v45 = vpop.f32.mrb[3].mxu1  ;;  %3513 = vmatprep.subr.bf16.mxu1 %v3805_v48 }
 0x121   :  { %v2300_v46 = vadd.f32 %v3211_v36, %v2260_v41  ;;  %3492 = vmatpush3.bf16.msra.mxu0 %v3806_v49 }
 0x122   :  { %3514 = vmatpush3.bf16.msra.mxu1 %v3807_v50  ;;  %3493 = vmatprep.subr.bf16.mxu0 %v3808_v51 }
 0x123   :  { %3515 = vmatprep.subr.bf16.mxu1 %v3809_v52 }
 0x125   :  { %3494 = vmatpush3.bf16.msra.mxu0 %v3810_v53 }
 0x126   :  { %3516 = vmatpush3.bf16.msra.mxu1 %v3811_v54 }
 0x128   :  { %2818 = vmatmul.mubr.bf16.vlgmr.msra.gmra.mrb[28].mxu0 %v2911_v57 }
 0x129   :  { %2858 = vmatmul.mubr.bf16.vlgmr.msra.gmra.mrb[28].mxu1 %v2913_v59 }
 0x13b   :  { %v3231_v61 = vpop.f32.mrb[4].mxu0 }
 0x13c   :  { %v3253_v62 = vpop.f32.mrb[4].mxu1  ;;  %v3232_v63 = vpop.f32.mrb[5].mxu0 }
 0x13d   :  { %v3254_v0 = vpop.f32.mrb[5].mxu1  ;;  %v3233_v1 = vadd.f32 %v3232_v63, %v3231_v61  ;;  %v3234_v3 = vpop.f32.mrb[6].mxu0 }
 0x13e   :  { %v3255_v2 = vadd.f32 %v3254_v0, %v3253_v62  ;;  %v3256_v4 = vpop.f32.mrb[6].mxu1  ;;  %v3235_v5 = vpop.f32.mrb[7].mxu0 }
 0x13f   :  { %v3257_v6 = vpop.f32.mrb[7].mxu1  ;;  %v2340_v7 = vadd.f32 %v3233_v1, %v2300_v46 }
 0x141   :  { %v2380_v8 = vadd.f32 %v3255_v2, %v2340_v7 }
 0x15b   :  { %v3275_v9 = vpop.f32.mrb[8].mxu0 }
 0x15c   :  { %v3297_v10 = vpop.f32.mrb[8].mxu1  ;;  %v3276_v11 = vpop.f32.mrb[9].mxu0 }
 0x15d   :  { %v3277_v12 = vadd.f32 %v3276_v11, %v3275_v9  ;;  %v3298_v13 = vpop.f32.mrb[9].mxu1  ;;  %v3278_v14 = vpop.f32.mrb[10].mxu0 }
 0x15e   :  { %v3299_v15 = vadd.f32 %v3298_v13, %v3297_v10  ;;  %v3300_v16 = vpop.f32.mrb[10].mxu1  ;;  %v3279_v17 = vpop.f32.mrb[11].mxu0 }
 0x15f   :  { %v2420_v18 = vadd.f32 %v3277_v12, %v2380_v8  ;;  %v3301_v19 = vpop.f32.mrb[11].mxu1 }
 0x161   :  { %v2460_v20 = vadd.f32 %v3299_v15, %v2420_v18 }
 0x17b   :  { %v3319_v21 = vpop.f32.mrb[12].mxu0 }
 0x17c   :  { %v3341_v22 = vpop.f32.mrb[12].mxu1  ;;  %v3320_v23 = vpop.f32.mrb[13].mxu0 }
 0x17d   :  { %v3321_v24 = vadd.f32 %v3320_v23, %v3319_v21  ;;  %v3342_v25 = vpop.f32.mrb[13].mxu1  ;;  %v3322_v26 = vpop.f32.mrb[14].mxu0 }
 0x17e   :  { %v3343_v27 = vadd.f32 %v3342_v25, %v3341_v22  ;;  %v3344_v28 = vpop.f32.mrb[14].mxu1  ;;  %v3323_v29 = vpop.f32.mrb[15].mxu0 }
 0x17f   :  { %v2500_v30 = vadd.f32 %v3321_v24, %v2460_v20  ;;  %v3345_v31 = vpop.f32.mrb[15].mxu1 }
 0x181   :  { %v2540_v32 = vadd.f32 %v3343_v27, %v2500_v30 }
 0x19b   :  { %v3363_v33 = vpop.f32.mrb[16].mxu0 }
 0x19c   :  { %v3385_v34 = vpop.f32.mrb[16].mxu1  ;;  %v3364_v35 = vpop.f32.mrb[17].mxu0 }
 0x19d   :  { %v3386_v36 = vpop.f32.mrb[17].mxu1  ;;  %v3365_v37 = vadd.f32 %v3364_v35, %v3363_v33  ;;  %v3366_v39 = vpop.f32.mrb[18].mxu0 }
 0x19e   :  { %v3387_v38 = vadd.f32 %v3386_v36, %v3385_v34  ;;  %v3388_v40 = vpop.f32.mrb[18].mxu1  ;;  %v3367_v41 = vpop.f32.mrb[19].mxu0 }
 0x19f   :  { %v3389_v42 = vpop.f32.mrb[19].mxu1  ;;  %v2580_v43 = vadd.f32 %v3365_v37, %v2540_v32 }
 0x1a1   :  { %v2620_v44 = vadd.f32 %v3387_v38, %v2580_v43 }
 0x1bb   :  { %v3407_v45 = vpop.f32.mrb[20].mxu0 }
 0x1bc   :  { %v3429_v46 = vpop.f32.mrb[20].mxu1  ;;  %v3408_v47 = vpop.f32.mrb[21].mxu0 }
 0x1bd   :  { %v3409_v48 = vadd.f32 %v3408_v47, %v3407_v45  ;;  %v3430_v49 = vpop.f32.mrb[21].mxu1  ;;  %v3410_v50 = vpop.f32.mrb[22].mxu0 }
 0x1be   :  { %v3431_v51 = vadd.f32 %v3430_v49, %v3429_v46  ;;  %v3432_v52 = vpop.f32.mrb[22].mxu1  ;;  %v3411_v53 = vpop.f32.mrb[23].mxu0 }
 0x1bf   :  { %v2660_v54 = vadd.f32 %v3409_v48, %v2620_v44  ;;  %v3433_v55 = vpop.f32.mrb[23].mxu1 }
 0x1c1   :  { %v2700_v56 = vadd.f32 %v3431_v51, %v2660_v54 }
 0x1db   :  { %v3451_v57 = vpop.f32.mrb[24].mxu0 }
 0x1dc   :  { %v3473_v58 = vpop.f32.mrb[24].mxu1  ;;  %v3452_v59 = vpop.f32.mrb[25].mxu0 }
 0x1dd   :  { %v3453_v60 = vadd.f32 %v3452_v59, %v3451_v57  ;;  %v3474_v61 = vpop.f32.mrb[25].mxu1  ;;  %v3454_v62 = vpop.f32.mrb[26].mxu0 }
 0x1de   :  { %v3475_v63 = vadd.f32 %v3474_v61, %v3473_v58  ;;  %v3476_v0 = vpop.f32.mrb[26].mxu1  ;;  %v3455_v1 = vpop.f32.mrb[27].mxu0 }
 0x1df   :  { %v2740_v2 = vadd.f32 %v3453_v60, %v2700_v56  ;;  %v3477_v3 = vpop.f32.mrb[27].mxu1 }
 0x1e1   :  { %v2780_v4 = vadd.f32 %v3475_v63, %v2740_v2 }
 0x1fb   :  { %v3495_v5 = vpop.f32.mrb[28].mxu0 }
 0x1fc   :  { %v3517_v6 = vpop.f32.mrb[28].mxu1  ;;  %v3496_v7 = vpop.f32.mrb[29].mxu0 }
 0x1fd   :  { %v3497_v8 = vadd.f32 %v3496_v7, %v3495_v5  ;;  %v3518_v9 = vpop.f32.mrb[29].mxu1  ;;  %v3498_v10 = vpop.f32.mrb[30].mxu0 }
 0x1fe   :  { %v3519_v11 = vadd.f32 %v3518_v9, %v3517_v6  ;;  %v3520_v12 = vpop.f32.mrb[30].mxu1  ;;  %v3499_v13 = vpop.f32.mrb[31].mxu0 }
 0x1ff   :  { %v2820_v14 = vadd.f32 %v3497_v8, %v2780_v4  ;;  %v3521_v15 = vpop.f32.mrb[31].mxu1 }
 0x201   :  { %v2860_v16 = vadd.f32 %v3519_v11, %v2820_v14 }
 0x203   :  { %2865 = vst [vmem:[#allocation7] sm:$0xff] %v2860_v16 }
 0x204   :  { %3871 = shalt.err (!%p3868_p6)
}
 0x205   :  { %s3872_s15 = scalar_lea.hbm %s3962_s3, 128 }
 0x206   :  { %p3873_p7 = scmp.ne.s32.totalorder %s3962_s3, %s3872_s15  ;;  %p3876_p8 = scmp.lt.u32.totalorder %s3872_s15, %s3962_s3 }
 0x208   :  { %p3878_p9 = pnand %p3876_p8, %p3873_p7 }
 0x20a   :  { %3881 = shalt.err (!%p3878_p9)
}
 0x20b   :  { %2875 = dma.vmem_to_hbm [thread:$0]  %s2873_s11, 128, %s3962_s3, [#allocation4]  }
 0x20c   :  { %3886 = dma.done.wait [#allocation4], 128  }
 0x20d   :  { %3887 = vsyncadd [#allocation4], 4294967168 }
 0x20e   :  { %2879 = vsyncpa [#allocation3], 1 }
 0x20f   :  { %2880 = vsyncpa [#allocation6], 1 }
 0x210   :  { %2881 = vsyncpa [#allocation4], 1 }

</bundles_post_ra>
